<compile_context>
chip_gen: v7x
topology: tpu7x:2x2x1
jax: 0.10.0
libtpu: 0.0.40
codegen_flags: <defaults>
</compile_context>

<pallas_src>
import jax
import jax.numpy as jnp
import numpy as np
from jax.experimental import pallas as pl
from jax.experimental.pallas import tpu as pltpu


# --------------------------------------------------------------------------- #
# Kernel builders
# --------------------------------------------------------------------------- #
def _make_ntxent_kernel(temperature: float, tn: int, mxu_dtype, fixed_shift: bool):
    """Returns (kernel_fn, scratch_fn(tm, C), acc_lanes)."""
    inv_t = float(1.0 / temperature)

    # Lane-group partial reduce: (tm, tn) -> (tm, acc_lanes) using only VPU adds
    # (static 128-lane-aligned slices; no cross-lane XLU work per grid step).
    if tn % 128 == 0:
        acc_lanes = 128
        ngroups = tn // 128

        def lane_partial(x):
            out = x[:, 0:128]
            for g in range(1, ngroups):
                out = out + x[:, g * 128:(g + 1) * 128]
            return out
    elif tn <= 128:
        acc_lanes = tn

        def lane_partial(x):
            return x
    else:
        # Odd tile width (>128, not a multiple of 128): fall back to a
        # per-step cross-lane reduce.
        acc_lanes = 1

        def lane_partial(x):
            return jnp.sum(x, axis=1, keepdims=True)

    def _normalize_rows(x):
        # torch F.normalize: x / max(||x||, 1e-12)  ==  x * rsqrt(max(sumsq, 1e-24))
        xf = x.astype(jnp.float32)
        inv = jax.lax.rsqrt(
            jnp.maximum(jnp.sum(xf * xf, axis=1, keepdims=True), 1e-24))
        return xf * inv

    dn = (((1,), (1,)), ((), ()))  # (tm, C) x (tn, C) contracting on C (NT matmul)

    if fixed_shift:
        # ---- fast path: logits bounded by 1/T, shift by the positive logit ----
        def kernel(p0_ref, p1_ref, n0_ref, n1_ref, out_ref,
                   p0s_sc, p1s_sc, pos_sc, s0_sc, s1_sc):
            j = pl.program_id(1)
            nj = pl.num_programs(1)

            # Once per row tile: normalize pos rows (fold 1/T in), cast to the
            # MXU dtype, compute the positive logit in fp32, zero accumulators.
            @pl.when(j == 0)
            def _init():
                p0n = _normalize_rows(p0_ref[...])
                p1n = _normalize_rows(p1_ref[...])
                pos_sc[...] = jnp.sum(p0n * p1n, axis=1, keepdims=True) * inv_t
                p0s_sc[...] = (p0n * inv_t).astype(mxu_dtype)
                p1s_sc[...] = (p1n * inv_t).astype(mxu_dtype)
                s0_sc[...] = jnp.zeros_like(s0_sc)
                s1_sc[...] = jnp.zeros_like(s1_sc)

            # (tm, C) x (tn, C) -> (tm, tn) on the MXU (bf16 operands, fp32 acc);
            # negatives arrive pre-normalized, pos rows already carry 1/T.
            l00 = jax.lax.dot_general(p0s_sc[...], n0_ref[...], dn,
                                      preferred_element_type=jnp.float32)
            l11 = jax.lax.dot_general(p1s_sc[...], n1_ref[...], dn,
                                      preferred_element_type=jnp.float32)

            pos = pos_sc[...]
            s0_sc[...] = s0_sc[...] + lane_partial(jnp.exp(l00 - pos))
            s1_sc[...] = s1_sc[...] + lane_partial(jnp.exp(l11 - pos))

            # Last negative tile: one cross-lane reduce per row tile.
            @pl.when(j == nj - 1)
            def _fin():
                t0 = jnp.sum(s0_sc[...], axis=1, keepdims=True)
                t1 = jnp.sum(s1_sc[...], axis=1, keepdims=True)
                # lse(row) - row[0] = log(1 + sum_k exp(l_k - pos))
                out_ref[...] = jnp.log(1.0 + t0) + jnp.log(1.0 + t1)

        def scratch_fn(tm, C):
            return [pltpu.VMEM((tm, C), mxu_dtype),        # normalized pos0 * 1/T
                    pltpu.VMEM((tm, C), mxu_dtype),        # normalized pos1 * 1/T
                    pltpu.VMEM((tm, 1), jnp.float32),      # positive logit
                    pltpu.VMEM((tm, acc_lanes), jnp.float32),  # exp-sum, row set 0
                    pltpu.VMEM((tm, acc_lanes), jnp.float32)]  # exp-sum, row set 1

    else:
        # ---- fallback path for very small temperatures: online logsumexp ----
        def kernel(p0_ref, p1_ref, n0_ref, n1_ref, out_ref,
                   p0s_sc, p1s_sc, pos_sc, m0_sc, s0_sc, m1_sc, s1_sc):
            j = pl.program_id(1)
            nj = pl.num_programs(1)

            @pl.when(j == 0)
            def _init():
                p0n = _normalize_rows(p0_ref[...])
                p1n = _normalize_rows(p1_ref[...])
                pos = jnp.sum(p0n * p1n, axis=1, keepdims=True) * inv_t
                pos_sc[...] = pos
                p0s_sc[...] = (p0n * inv_t).astype(mxu_dtype)
                p1s_sc[...] = (p1n * inv_t).astype(mxu_dtype)
                m0_sc[...] = pos
                m1_sc[...] = pos
                s0_sc[...] = jnp.ones_like(pos)
                s1_sc[...] = jnp.ones_like(pos)

            l00 = jax.lax.dot_general(p0s_sc[...], n0_ref[...], dn,
                                      preferred_element_type=jnp.float32)
            l11 = jax.lax.dot_general(p1s_sc[...], n1_ref[...], dn,
                                      preferred_element_type=jnp.float32)

            def online_update(m_sc, s_sc, blk):
                m_old = m_sc[...]
                m_new = jnp.maximum(m_old, jnp.max(blk, axis=1, keepdims=True))
                s_sc[...] = (s_sc[...] * jnp.exp(m_old - m_new)
                             + jnp.sum(jnp.exp(blk - m_new), axis=1, keepdims=True))
                m_sc[...] = m_new

            online_update(m0_sc, s0_sc, l00)
            online_update(m1_sc, s1_sc, l11)

            @pl.when(j == nj - 1)
            def _fin():
                pos = pos_sc[...]
                out_ref[...] = ((jnp.log(s0_sc[...]) + m0_sc[...] - pos)
                                + (jnp.log(s1_sc[...]) + m1_sc[...] - pos))

        def scratch_fn(tm, C):
            return [pltpu.VMEM((tm, C), mxu_dtype),
                    pltpu.VMEM((tm, C), mxu_dtype),
                    pltpu.VMEM((tm, 1), jnp.float32),   # positive logit
                    pltpu.VMEM((tm, 1), jnp.float32),   # running max, set 0
                    pltpu.VMEM((tm, 1), jnp.float32),   # running sum, set 0
                    pltpu.VMEM((tm, 1), jnp.float32),   # running max, set 1
                    pltpu.VMEM((tm, 1), jnp.float32)]   # running sum, set 1

    return kernel, scratch_fn, acc_lanes


# --------------------------------------------------------------------------- #
# Tiling / VMEM helpers
# --------------------------------------------------------------------------- #
def _pick_tile(n: int, target: int, step: int) -> int:
    """Largest multiple-of-`step` divisor of n that is <= target, else n itself."""
    if n <= target:
        return n
    t = (min(target, n) // step) * step
    while t >= step:
        if n % t == 0:
            return t
        t -= step
    return n
    # TODO(synk): add a padded/masked tile path for huge B with no small divisor.


def _acc_lanes(tn: int) -> int:
    if tn % 128 == 0:
        return 128
    if tn <= 128:
        return tn
    return 1


def _estimate_vmem(tm, tn, C, in_item, mx_item, acc_lanes, fixed_shift):
    pos_blocks = 2 * 2 * tm * C * in_item      # pos0/pos1, double-buffered
    neg_blocks = 2 * 2 * tn * C * mx_item      # neg0/neg1, double-buffered (bf16)
    out_block = 2 * tm * 4
    scratch = 2 * tm * C * mx_item + tm * 4
    if fixed_shift:
        scratch += 2 * tm * acc_lanes * 4
    else:
        scratch += 4 * tm * 4
    return pos_blocks + neg_blocks + out_block + scratch


# --------------------------------------------------------------------------- #
# Public wrapper
# --------------------------------------------------------------------------- #
def ntxent_negative_mined_loss(pos0, pos1, neg0, neg1,
                               temperature: float = 0.1,
                               row_tile: int = 512,
                               col_tile: int = 512,
                               mxu_dtype=jnp.bfloat16,
                               min_row_tiles: int = 1,
                               neg_buffers: int = 2):
    """Pallas TPU implementation of NTXentNegativeMinedLoss.forward."""
    eps = 1e-8
    if abs(float(temperature)) < eps:
        raise ValueError(f"Illegal temperature: abs({temperature}) < 1e-8")

    B, C = pos0.shape
    mxu_dtype = jnp.dtype(mxu_dtype)
    in_item = jnp.dtype(pos0.dtype).itemsize
    mx_item = mxu_dtype.itemsize

    # Negatives: L2-normalize once (fp32 math) and cast to the MXU dtype in a
    # single fused XLA pass.  This pass is amortized over the n_i times the
    # negatives are re-streamed by the kernel and removes all per-grid-step
    # negative normalization (cast + XLU square-sum + rsqrt + multiply).
    def _norm_cast(x):
        xf = x.astype(jnp.float32)
        inv = jax.lax.rsqrt(
            jnp.maximum(jnp.sum(xf * xf, axis=1, keepdims=True), 1e-24))
        return (xf * inv).astype(mxu_dtype)

    neg0n = _norm_cast(neg0)
    neg1n = _norm_cast(neg1)

    # bf16 tiles pack (16,128) per vreg -> step tiles by 16 for sub-32-bit dtypes.
    step = 16 if min(in_item, mx_item) < 4 else 8
    tm = _pick_tile(B, row_tile, step)
    tn = _pick_tile(B, col_tile, step)

    # v7x megacore: ensure the "parallel" row axis has at least min_row_tiles
    # tiles so both TensorCores get work.
    while min_row_tiles > 1 and (B // tm) < min_row_tiles:
        cand = _pick_tile(B, max(step, tm // 2), step)
        if cand >= tm:
            break
        tm = cand

    # Fixed-shift logsumexp is numerically safe when exp(2/T) stays in fp32 range.
    fixed_shift = (2.0 / abs(float(temperature))) <= 80.0

    # Shrink tiles until the estimate fits the tightest (v7x, 64 MiB) budget.
    budget = 30 * 1024 * 1024
    est = _estimate_vmem(tm, tn, C, in_item, mx_item, _acc_lanes(tn), fixed_shift)
    for _ in range(8):
        if est <= budget:
            break
        if tn >= tm and tn > step:
            cand = _pick_tile(B, max(step, tn // 2), step)
            if cand < tn:
                tn = cand
                est = _estimate_vmem(tm, tn, C, in_item, mx_item,
                                     _acc_lanes(tn), fixed_shift)
                continue
        if tm > step:
            cand = _pick_tile(B, max(step, tm // 2), step)
            if cand < tm:
                tm = cand
                est = _estimate_vmem(tm, tn, C, in_item, mx_item,
                                     _acc_lanes(tn), fixed_shift)
                continue
        break

    # Scoped-VMEM limit: v5e defaults to only 16 MiB, so raise it early; cap at
    # 48 MiB so v7x (64 MiB physical per TC) keeps compiler headroom.
    vmem_limit = None
    if est > 12 * 1024 * 1024:
        vmem_limit = int(min(max(est * 3 // 2, 16 * 1024 * 1024),
                             48 * 1024 * 1024))

    n_i = B // tm
    n_j = B // tn

    kernel, scratch_fn, _ = _make_ntxent_kernel(temperature, tn, mxu_dtype,
                                                fixed_shift)

    row_spec = pl.BlockSpec((tm, C), lambda i, j: (i, 0))   # resident across j
    if neg_buffers != 2:
        col_spec = pl.BlockSpec((tn, C), lambda i, j: (j, 0),
                                pipeline_mode=pl.Buffered(neg_buffers))
    else:
        col_spec = pl.BlockSpec((tn, C), lambda i, j: (j, 0))  # streamed over j

    per_row = pl.pallas_call(
        kernel,
        out_shape=jax.ShapeDtypeStruct((B, 1), jnp.float32),
        grid=(n_i, n_j),
        in_specs=[row_spec, row_spec, col_spec, col_spec],
        out_specs=pl.BlockSpec((tm, 1), lambda i, j: (i, 0)),
        scratch_shapes=scratch_fn(tm, C),
        compiler_params=pltpu.CompilerParams(
            dimension_semantics=("parallel", "arbitrary"),
            vmem_limit_bytes=vmem_limit),
    )(pos0, pos1, neg0n, neg1n)

    # per_row[i] = loss(row i of block 0) + loss(row i of block 1); mean over 2B rows.
    return jnp.sum(per_row) / jnp.float32(2 * B)


# --------------------------------------------------------------------------- #
# Pure-JAX reference (mirrors the PyTorch module exactly)
# --------------------------------------------------------------------------- #
def _reference_loss(pos0, pos1, neg0, neg1, temperature=0.1):
    def normalize(x):
        n = jnp.linalg.norm(x, axis=1, keepdims=True)
        return x / jnp.maximum(n, 1e-12)

    B = pos0.shape[0]
    p0, p1, n0, n1 = map(normalize, (pos0, pos1, neg0, neg1))
    l00 = p0 @ n0.T / temperature
    l01 = p0 @ p1.T / temperature
    l10 = p1 @ p0.T / temperature
    l11 = p1 @ n1.T / temperature
    d01 = jnp.diag(l01).reshape(B, 1)
    d10 = jnp.diag(l10).reshape(B, 1)
    logits = jnp.concatenate(
        [jnp.concatenate([d01, l00], axis=1),
         jnp.concatenate([d10, l11], axis=1)], axis=0)
    lse = jax.scipy.special.logsumexp(logits, axis=1)
    return jnp.mean(lse - logits[:, 0])


# --------------------------------------------------------------------------- #
# Self-test
# --------------------------------------------------------------------------- #
if __name__ == "__main__":
    key = jax.random.PRNGKey(0)
    keys = jax.random.split(key, 16)

    def mk(kset, B, C, dtype=jnp.float32):
        return tuple(jax.random.normal(k, (B, C), dtype=jnp.float32).astype(dtype)
                     for k in kset)

    # --- test 1: single tile, fp32 MXU path (tight tolerance) ---
    p0, p1, n0, n1 = mk(keys[0:4], 8, 32)
    out = jax.block_until_ready(
        ntxent_negative_mined_loss(p0, p1, n0, n1, temperature=0.1,
                                   mxu_dtype=jnp.float32))
    ref = _reference_loss(p0, p1, n0, n1, temperature=0.1)
    np.testing.assert_allclose(np.asarray(out), np.asarray(ref),
                               rtol=1e-5, atol=1e-5)

    # --- test 2: multi-tile grid (2x2), fp32 MXU path, exercises the carry ---
    p0, p1, n0, n1 = mk(keys[4:8], 32, 128)
    out = jax.block_until_ready(
        ntxent_negative_mined_loss(p0, p1, n0, n1, temperature=0.1,
                                   row_tile=16, col_tile=16,
                                   mxu_dtype=jnp.float32))
    ref = _reference_loss(p0, p1, n0, n1, temperature=0.1)
    np.testing.assert_allclose(np.asarray(out), np.asarray(ref),
                               rtol=1e-5, atol=1e-5)

    # --- test 3: tiny temperature -> online-logsumexp fallback path ---
    p0, p1, n0, n1 = mk(keys[8:12], 16, 32)
    out = jax.block_until_ready(
        ntxent_negative_mined_loss(p0, p1, n0, n1, temperature=0.02,
                                   row_tile=8, col_tile=8,
                                   mxu_dtype=jnp.float32))
    ref = _reference_loss(p0, p1, n0, n1, temperature=0.02)
    np.testing.assert_allclose(np.asarray(out), np.asarray(ref),
                               rtol=1e-4, atol=1e-4)

    # --- test 4: default bf16 MXU path with fp32 inputs (looser tolerance) ---
    p0, p1, n0, n1 = mk(keys[12:16], 16, 64)
    out = jax.block_until_ready(
        ntxent_negative_mined_loss(p0, p1, n0, n1, temperature=0.1))
    ref = _reference_loss(p0, p1, n0, n1, temperature=0.1)
    np.testing.assert_allclose(np.asarray(out), np.asarray(ref),
                               rtol=3e-2, atol=3e-2)

    # --- test 5: bf16 inputs, bf16 MXU, multi-tile (2x2) ---
    p0, p1, n0, n1 = mk(keys[4:8], 32, 128, dtype=jnp.bfloat16)
    out = jax.block_until_ready(
        ntxent_negative_mined_loss(p0, p1, n0, n1, temperature=0.1,
                                   row_tile=16, col_tile=16))
    ref = _reference_loss(*(x.astype(jnp.float32) for x in (p0, p1, n0, n1)),
                          temperature=0.1)
    np.testing.assert_allclose(np.asarray(out), np.asarray(ref),
                               rtol=3e-2, atol=3e-2)

    print("KERNEL_OK")
</pallas_src>

<mosaic_0001>
module attributes {stable_mosaic.version = 11 : i64} {
  func.func @kernel(%arg0: i32, %arg1: i32, %arg2: memref<8x32xf32, #tpu.memory_space<vmem>>, %arg3: memref<8x32xf32, #tpu.memory_space<vmem>>, %arg4: memref<8x32xf32, #tpu.memory_space<vmem>>, %arg5: memref<8x32xf32, #tpu.memory_space<vmem>>, %arg6: memref<8x1xf32, #tpu.memory_space<vmem>>, %arg7: memref<8x32xf32, #tpu.memory_space<vmem>>, %arg8: memref<8x32xf32, #tpu.memory_space<vmem>>, %arg9: memref<8x1xf32, #tpu.memory_space<vmem>>, %arg10: memref<8x8xf32, #tpu.memory_space<vmem>>, %arg11: memref<8x8xf32, #tpu.memory_space<vmem>>) attributes {dimension_semantics = [#tpu.dimension_semantics<parallel>, #tpu.dimension_semantics<arbitrary>], iteration_bounds = array<i64: 1, 1>, scalar_prefetch = 0 : i64, scratch_operands = 5 : i64, tpu.core_type = #tpu.core_type<tc>, window_params = [{transform_indices = @transform_0, window_bounds = array<i64: 8, 32>}, {transform_indices = @transform_1, window_bounds = array<i64: 8, 32>}, {transform_indices = @transform_2, window_bounds = array<i64: 8, 32>}, {transform_indices = @transform_3, window_bounds = array<i64: 8, 32>}, {transform_indices = @transform_4, window_bounds = array<i64: 8, 1>}]} {
    %c0_i32 = arith.constant 0 : i32
    %0 = arith.cmpi eq, %arg1, %c0_i32 : i32
    %1 = arith.extui %0 : i1 to i32
    %c0_i32_0 = arith.constant 0 : i32
    %2 = arith.cmpi ne, %1, %c0_i32_0 : i32
    scf.if %2 {
      %c0_21 = arith.constant 0 : index
      %c0_22 = arith.constant 0 : index
      %25 = vector.load %arg2[%c0_21, %c0_22] : memref<8x32xf32, #tpu.memory_space<vmem>>, vector<8x32xf32>
      %26 = arith.mulf %25, %25 : vector<8x32xf32>
      %cst_23 = arith.constant dense<0.000000e+00> : vector<8xf32>
      %27 = vector.multi_reduction <add>, %26, %cst_23 [1] : vector<8x32xf32> to vector<8xf32>
      %28 = vector.shape_cast %27 : vector<8xf32> to vector<8x1xf32>
      %cst_24 = arith.constant 1.000000e-24 : f32
      %29 = vector.broadcast %cst_24 : f32 to vector<8x1xf32>
      %30 = arith.maximumf %28, %29 : vector<8x1xf32>
      %31 = math.rsqrt %30 : vector<8x1xf32>
      %32 = vector.broadcast %31 : vector<8x1xf32> to vector<8x32xf32>
      %33 = arith.mulf %25, %32 : vector<8x32xf32>
      %c0_25 = arith.constant 0 : index
      %c0_26 = arith.constant 0 : index
      %34 = vector.load %arg3[%c0_25, %c0_26] : memref<8x32xf32, #tpu.memory_space<vmem>>, vector<8x32xf32>
      %35 = arith.mulf %34, %34 : vector<8x32xf32>
      %cst_27 = arith.constant dense<0.000000e+00> : vector<8xf32>
      %36 = vector.multi_reduction <add>, %35, %cst_27 [1] : vector<8x32xf32> to vector<8xf32>
      %37 = vector.shape_cast %36 : vector<8xf32> to vector<8x1xf32>
      %cst_28 = arith.constant 1.000000e-24 : f32
      %38 = vector.broadcast %cst_28 : f32 to vector<8x1xf32>
      %39 = arith.maximumf %37, %38 : vector<8x1xf32>
      %40 = math.rsqrt %39 : vector<8x1xf32>
      %41 = vector.broadcast %40 : vector<8x1xf32> to vector<8x32xf32>
      %42 = arith.mulf %34, %41 : vector<8x32xf32>
      %43 = arith.mulf %33, %42 : vector<8x32xf32>
      %cst_29 = arith.constant dense<0.000000e+00> : vector<8xf32>
      %44 = vector.multi_reduction <add>, %43, %cst_29 [1] : vector<8x32xf32> to vector<8xf32>
      %45 = vector.shape_cast %44 : vector<8xf32> to vector<8x1xf32>
      %cst_30 = arith.constant 1.000000e+01 : f32
      %46 = vector.broadcast %cst_30 : f32 to vector<8x1xf32>
      %47 = arith.mulf %45, %46 : vector<8x1xf32>
      %c0_31 = arith.constant 0 : index
      %c0_32 = arith.constant 0 : index
      %48 = vector.load %arg9[%c0_31, %c0_32] : memref<8x1xf32, #tpu.memory_space<vmem>>, vector<8x1xf32>
      tpu.vector_store %arg9[%c0_31, %c0_32], %47 {strides = array<i32>} : memref<8x1xf32, #tpu.memory_space<vmem>>, vector<8x1xf32>,
      %cst_33 = arith.constant 1.000000e+01 : f32
      %49 = vector.broadcast %cst_33 : f32 to vector<8x32xf32>
      %50 = arith.mulf %33, %49 : vector<8x32xf32>
      %c0_34 = arith.constant 0 : index
      %c0_35 = arith.constant 0 : index
      %51 = vector.load %arg7[%c0_34, %c0_35] : memref<8x32xf32, #tpu.memory_space<vmem>>, vector<8x32xf32>
      tpu.vector_store %arg7[%c0_34, %c0_35], %50 {strides = array<i32>} : memref<8x32xf32, #tpu.memory_space<vmem>>, vector<8x32xf32>,
      %cst_36 = arith.constant 1.000000e+01 : f32
      %52 = vector.broadcast %cst_36 : f32 to vector<8x32xf32>
      %53 = arith.mulf %42, %52 : vector<8x32xf32>
      %c0_37 = arith.constant 0 : index
      %c0_38 = arith.constant 0 : index
      %54 = vector.load %arg8[%c0_37, %c0_38] : memref<8x32xf32, #tpu.memory_space<vmem>>, vector<8x32xf32>
      tpu.vector_store %arg8[%c0_37, %c0_38], %53 {strides = array<i32>} : memref<8x32xf32, #tpu.memory_space<vmem>>, vector<8x32xf32>,
      %cst_39 = arith.constant 0.000000e+00 : f32
      %55 = vector.broadcast %cst_39 : f32 to vector<8x8xf32>
      %c0_40 = arith.constant 0 : index
      %c0_41 = arith.constant 0 : index
      %56 = vector.load %arg10[%c0_40, %c0_41] : memref<8x8xf32, #tpu.memory_space<vmem>>, vector<8x8xf32>
      tpu.vector_store %arg10[%c0_40, %c0_41], %55 {strides = array<i32>} : memref<8x8xf32, #tpu.memory_space<vmem>>, vector<8x8xf32>,
      %cst_42 = arith.constant 0.000000e+00 : f32
      %57 = vector.broadcast %cst_42 : f32 to vector<8x8xf32>
      %c0_43 = arith.constant 0 : index
      %c0_44 = arith.constant 0 : index
      %58 = vector.load %arg11[%c0_43, %c0_44] : memref<8x8xf32, #tpu.memory_space<vmem>>, vector<8x8xf32>
      tpu.vector_store %arg11[%c0_43, %c0_44], %57 {strides = array<i32>} : memref<8x8xf32, #tpu.memory_space<vmem>>, vector<8x8xf32>,
    } else {
    }
    %c0 = arith.constant 0 : index
    %c0_1 = arith.constant 0 : index
    %3 = vector.load %arg7[%c0, %c0_1] : memref<8x32xf32, #tpu.memory_space<vmem>>, vector<8x32xf32>
    %c0_2 = arith.constant 0 : index
    %c0_3 = arith.constant 0 : index
    %4 = vector.load %arg4[%c0_2, %c0_3] : memref<8x32xf32, #tpu.memory_space<vmem>>, vector<8x32xf32>
    %cst = arith.constant dense<0.000000e+00> : vector<8x8xf32>
    %5 = tpu.matmul %3, %4, %cst {dimension_numbers = #tpu.dot_dimension_numbers<[1], [1], [0], [0], [0, 0, 1, 0], [], []>} : vector<8x32xf32>, vector<8x32xf32>, vector<8x8xf32> -> vector<8x8xf32>
    %c0_4 = arith.constant 0 : index
    %c0_5 = arith.constant 0 : index
    %6 = vector.load %arg8[%c0_4, %c0_5] : memref<8x32xf32, #tpu.memory_space<vmem>>, vector<8x32xf32>
    %c0_6 = arith.constant 0 : index
    %c0_7 = arith.constant 0 : index
    %7 = vector.load %arg5[%c0_6, %c0_7] : memref<8x32xf32, #tpu.memory_space<vmem>>, vector<8x32xf32>
    %cst_8 = arith.constant dense<0.000000e+00> : vector<8x8xf32>
    %8 = tpu.matmul %6, %7, %cst_8 {dimension_numbers = #tpu.dot_dimension_numbers<[1], [1], [0], [0], [0, 0, 1, 0], [], []>} : vector<8x32xf32>, vector<8x32xf32>, vector<8x8xf32> -> vector<8x8xf32>
    %c0_9 = arith.constant 0 : index
    %c0_10 = arith.constant 0 : index
    %9 = vector.load %arg9[%c0_9, %c0_10] : memref<8x1xf32, #tpu.memory_space<vmem>>, vector<8x1xf32>
    %c0_11 = arith.constant 0 : index
    %c0_12 = arith.constant 0 : index
    %10 = vector.load %arg10[%c0_11, %c0_12] : memref<8x8xf32, #tpu.memory_space<vmem>>, vector<8x8xf32>
    %11 = vector.broadcast %9 : vector<8x1xf32> to vector<8x8xf32>
    %12 = arith.subf %5, %11 : vector<8x8xf32>
    %13 = math.exp %12 : vector<8x8xf32>
    %14 = arith.addf %10, %13 : vector<8x8xf32>
    %c0_13 = arith.constant 0 : index
    %c0_14 = arith.constant 0 : index
    %15 = vector.load %arg10[%c0_13, %c0_14] : memref<8x8xf32, #tpu.memory_space<vmem>>, vector<8x8xf32>
    tpu.vector_store %arg10[%c0_13, %c0_14], %14 {strides = array<i32>} : memref<8x8xf32, #tpu.memory_space<vmem>>, vector<8x8xf32>,
    %c0_15 = arith.constant 0 : index
    %c0_16 = arith.constant 0 : index
    %16 = vector.load %arg11[%c0_15, %c0_16] : memref<8x8xf32, #tpu.memory_space<vmem>>, vector<8x8xf32>
    %17 = vector.broadcast %9 : vector<8x1xf32> to vector<8x8xf32>
    %18 = arith.subf %8, %17 : vector<8x8xf32>
    %19 = math.exp %18 : vector<8x8xf32>
    %20 = arith.addf %16, %19 : vector<8x8xf32>
    %c0_17 = arith.constant 0 : index
    %c0_18 = arith.constant 0 : index
    %21 = vector.load %arg11[%c0_17, %c0_18] : memref<8x8xf32, #tpu.memory_space<vmem>>, vector<8x8xf32>
    tpu.vector_store %arg11[%c0_17, %c0_18], %20 {strides = array<i32>} : memref<8x8xf32, #tpu.memory_space<vmem>>, vector<8x8xf32>,
    %c0_i32_19 = arith.constant 0 : i32
    %22 = arith.cmpi eq, %arg1, %c0_i32_19 : i32
    %23 = arith.extui %22 : i1 to i32
    %c0_i32_20 = arith.constant 0 : i32
    %24 = arith.cmpi ne, %23, %c0_i32_20 : i32
    scf.if %24 {
      %c0_21 = arith.constant 0 : index
      %c0_22 = arith.constant 0 : index
      %25 = vector.load %arg10[%c0_21, %c0_22] : memref<8x8xf32, #tpu.memory_space<vmem>>, vector<8x8xf32>
      %cst_23 = arith.constant dense<0.000000e+00> : vector<8xf32>
      %26 = vector.multi_reduction <add>, %25, %cst_23 [1] : vector<8x8xf32> to vector<8xf32>
      %27 = vector.shape_cast %26 : vector<8xf32> to vector<8x1xf32>
      %c0_24 = arith.constant 0 : index
      %c0_25 = arith.constant 0 : index
      %28 = vector.load %arg11[%c0_24, %c0_25] : memref<8x8xf32, #tpu.memory_space<vmem>>, vector<8x8xf32>
      %cst_26 = arith.constant dense<0.000000e+00> : vector<8xf32>
      %29 = vector.multi_reduction <add>, %28, %cst_26 [1] : vector<8x8xf32> to vector<8xf32>
      %30 = vector.shape_cast %29 : vector<8xf32> to vector<8x1xf32>
      %cst_27 = arith.constant 1.000000e+00 : f32
      %31 = vector.broadcast %cst_27 : f32 to vector<8x1xf32>
      %32 = arith.addf %31, %27 : vector<8x1xf32>
      %33 = math.log %32 : vector<8x1xf32>
      %cst_28 = arith.constant 1.000000e+00 : f32
      %34 = vector.broadcast %cst_28 : f32 to vector<8x1xf32>
      %35 = arith.addf %34, %30 : vector<8x1xf32>
      %36 = math.log %35 : vector<8x1xf32>
      %37 = arith.addf %33, %36 : vector<8x1xf32>
      %c0_29 = arith.constant 0 : index
      %c0_30 = arith.constant 0 : index
      %38 = vector.load %arg6[%c0_29, %c0_30] : memref<8x1xf32, #tpu.memory_space<vmem>>, vector<8x1xf32>
      tpu.vector_store %arg6[%c0_29, %c0_30], %37 {strides = array<i32>} : memref<8x1xf32, #tpu.memory_space<vmem>>, vector<8x1xf32>,
    } else {
    }
    return
  }
  func.func @transform_0(%arg0: i32, %arg1: i32) -> (i32, i32) {
    %c0_i32 = arith.constant 0 : i32
    %c0_i32_0 = arith.constant 0 : i32
    return %arg0, %c0_i32 : i32, i32
  }
  func.func @transform_1(%arg0: i32, %arg1: i32) -> (i32, i32) {
    %c0_i32 = arith.constant 0 : i32
    %c0_i32_0 = arith.constant 0 : i32
    return %arg0, %c0_i32 : i32, i32
  }
  func.func @transform_2(%arg0: i32, %arg1: i32) -> (i32, i32) {
    %c0_i32 = arith.constant 0 : i32
    %c0_i32_0 = arith.constant 0 : i32
    return %arg1, %c0_i32 : i32, i32
  }
  func.func @transform_3(%arg0: i32, %arg1: i32) -> (i32, i32) {
    %c0_i32 = arith.constant 0 : i32
    %c0_i32_0 = arith.constant 0 : i32
    return %arg1, %c0_i32 : i32, i32
  }
  func.func @transform_4(%arg0: i32, %arg1: i32) -> (i32, i32) {
    %c0_i32 = arith.constant 0 : i32
    %c0_i32_0 = arith.constant 0 : i32
    return %arg0, %c0_i32 : i32, i32
  }
}

</mosaic_0001>

<bundles_post_ra>
// kernel: tpu_custom_call.1
= control target key start
LH: loop header
LB: loop body
LE: loop exit
PB: predicated region body
PF: predicated region fallthrough
CT: control target
= control target key end

     0   :  { %9 = vsyncpa [#allocation8], 0  ;;  %s487_s0 = inlined_call_operand.hbm [shape: f32[8,32], index: 0, kind: input, shape index: {}]   ;;  %s488_s1 = inlined_call_operand.hbm [shape: f32[8,32], index: 1, kind: input, shape index: {}]   ;;  %s489_s2 = inlined_call_operand.hbm [shape: f32[8,32], index: 2, kind: input, shape index: {}]   ;;  %s490_s3 = inlined_call_operand.vmem [shape: f32[8,32], index: 3, kind: input, shape index: {}]   ;;  %s491_s4 = inlined_call_operand.vmem [shape: f32[8,1], index: 4, kind: output, shape index: {}]  }
   0x1   :  { %10 = vsyncpa [#allocation10], 0  ;;  %s397_s15 = smov [#allocation9]   ;;  %s398_s17 = smov [#allocation7]  }
   0x2   :  { %s27_s16 = sshll.u32 %s397_s15, 4  ;;  %s17_s18 = sshll.u32 %s398_s17, 4  ;;  %s28_s16 = int_to_ptr.vmem [resolvable:$true] %s27_s16  ;;  %s18_s18 = int_to_ptr.vmem [resolvable:$true] %s17_s18 }
   0x3   :  { %s327_s21 = scalar_lea.hbm %s488_s1, 128 }
   0x4   :  { %p328_p0 = scmp.ne.s32.totalorder %s488_s1, %s327_s21  ;;  %p331_p1 = scmp.lt.u32.totalorder %s327_s21, %s488_s1 }
   0x6   :  { %p333_p2 = pnand %p331_p1, %p328_p0 }
   0x8   :  { %336 = shalt.err (!%p333_p2)
}
   0x9   :  { %s337_s26 = scalar_lea.vmem %s28_s16, 128  ;;  %p342_p4 = scmp.lt.s32.totalorder %s28_s16, %s28_s16 }
   0xa   :  { %p338_p3 = scmp.ne.s32.totalorder %s28_s16, %s337_s26  ;;  %p343_p5 = scmp.lt.s32.totalorder %s337_s26, %s337_s26 }
   0xc   :  { %p344_p6 = por %p343_p5, %p342_p4 }
   0xe   :  { %p345_p7 = pnand %p344_p6, %p338_p3 }
  0x10   :  { %348 = shalt.err (!%p345_p7)
}
  0x11   :  { %30 = dma.hbm_to_vmem [thread:$0]  %s488_s1, 128, %s28_s16, [#allocation10]  }
  0x12   :  { %s349_s5 = scalar_lea.hbm %s487_s0, 128 }
  0x13   :  { %p350_p8 = scmp.ne.s32.totalorder %s487_s0, %s349_s5  ;;  %p353_p9 = scmp.lt.u32.totalorder %s349_s5, %s487_s0 }
  0x15   :  { %p355_p10 = pnand %p353_p9, %p350_p8 }
  0x17   :  { %358 = shalt.err (!%p355_p10)
}
  0x18   :  { %s359_s10 = scalar_lea.vmem %s18_s18, 128  ;;  %p364_p12 = scmp.lt.s32.totalorder %s18_s18, %s18_s18 }
  0x19   :  { %p360_p11 = scmp.ne.s32.totalorder %s18_s18, %s359_s10  ;;  %p365_p13 = scmp.lt.s32.totalorder %s359_s10, %s359_s10 }
  0x1b   :  { %p366_p0 = por %p365_p13, %p364_p12 }
  0x1d   :  { %p367_p1 = pnand %p366_p0, %p360_p11 }
  0x1f   :  { %370 = shalt.err (!%p367_p1)
}
  0x20   :  { %20 = dma.hbm_to_vmem [thread:$0]  %s487_s0, 128, %s18_s18, [#allocation8]  }
  0x21   :  { %s399_s12 = smov [#allocation11]   ;;  %s371_s16 = scalar_lea.hbm %s489_s2, 128 }
  0x22   :  { %s37_s13 = sshll.u32 %s399_s12, 4  ;;  %p372_p2 = scmp.ne.s32.totalorder %s489_s2, %s371_s16  ;;  %s38_s13 = int_to_ptr.vmem [resolvable:$true] %s37_s13 }
  0x23   :  { %p375_p3 = scmp.lt.u32.totalorder %s371_s16, %s489_s2 }
  0x25   :  { %p377_p4 = pnand %p375_p3, %p372_p2 }
  0x27   :  { %380 = shalt.err (!%p377_p4)
}
  0x28   :  { %s381_s22 = scalar_lea.vmem %s38_s13, 128  ;;  %p386_p6 = scmp.lt.s32.totalorder %s38_s13, %s38_s13 }
  0x29   :  { %p382_p5 = scmp.ne.s32.totalorder %s38_s13, %s381_s22  ;;  %p387_p7 = scmp.lt.s32.totalorder %s381_s22, %s381_s22 }
  0x2b   :  { %p388_p8 = por %p387_p7, %p386_p6 }
  0x2d   :  { %p389_p9 = pnand %p388_p8, %p382_p5 }
  0x2f   :  { %392 = shalt.err (!%p389_p9)
}
  0x30   :  { %40 = dma.hbm_to_vmem [thread:$0]  %s489_s2, 128, %s38_s13, [#allocation10]  }
  0x31   :  { %393 = dma.done.wait [#allocation8], 128  }
  0x32   :  { %394 = vsyncadd [#allocation8], 4294967168 }
  0x33   :  { %395 = dma.done.wait [#allocation10], 256  }
  0x34   :  { %396 = vsyncadd [#allocation10], 4294967040  ;;  %v56_v0 = vld [vmem:[#allocation7] sm:$0xff]  ;;  %vm58_vm0 = vcmask 261120   ;;  %v65_v1 = vld [vmem:[#allocation9] sm:$0xff]  ;;  %v400_v7 = vmov 0.0  }
  0x35   :  { %v57_v2 = vmul.f32 %v56_v0, %v56_v0  ;;  %v66_v3 = vmul.f32 %v65_v1, %v65_v1  ;;  %v88_v6 = vld [vmem:[#allocation11] sm:$0xff]  ;;  %297 = vmatprep.subr.mxu0 %v400_v7  ;;  %302 = vmatprep.subr.mxu1 %v400_v7  ;;  %vm401_vm1 = vmmov 0   ;;  %v402_v23 = vmov 0  }
  0x36   :  { %298 = vmatpush3.xpose.msk.msra.mxu0 %vm58_vm0, %v88_v6  ;;  %299 = vmatprep.mubr.msk.f32.mxu0 %vm401_vm1, %v400_v7  ;;  %v167_v8 = vld [vmem:[%s490_s3] sm:$0xff]  ;;  %vm78_vm2 = vcmask 7168   ;;  %vm84_vm3 = vcmask 64512  }
  0x37   :  { %v59_v4 = vsel %vm58_vm0, %v57_v2, 0.0  ;;  %v67_v5 = vsel %vm58_vm0, %v66_v3, 0.0  ;;  %304 = vmatprep.mubr.msk.f32.mxu1 %vm401_vm1, %v400_v7  ;;  %303 = vmatpush3.xpose.msk.msra.mxu1 %vm58_vm0, %v167_v8  ;;  %85 = vst.msk [vmem:[#allocation5] sm:$0xff] %vm84_vm3, %v400_v7  ;;  %86 = vst.msk [vmem:[#allocation6] sm:$0xff] %vm84_vm3, %v400_v7 }
  0x38   :  { %60 = vadd.xlane.f32.xlu0 %v59_v4  ;;  %313 = vset.pattern.permute.xlu1 %v402_v23 }
  0x39   :  { %314 = vset.pattern.permute.xlu0 %v402_v23 }
  0x3c   :  { %68 = vadd.xlane.f32.xlu0 %v67_v5 }
  0x3e   :  { %v245_v36 = vld [vmem:[#allocation5] sm:$0xff]  ;;  %v257_v37 = vld [vmem:[#allocation6] sm:$0xff] }
  0xc5   :  { %v61_v9 = vpop.xlane.xlu0 %60 }
  0xc6   :  { %v62_v10 = vmax.f32 %v61_v9, 1e-24 }
  0xc8   :  { %315 = vrsqrt.f32 %v62_v10 }
  0xc9   :  { %v69_v11 = vpop.xlane.xlu0 %68 }
  0xca   :  { %v70_v12 = vmax.f32 %v69_v11, 1e-24 }
  0xcc   :  { %317 = vrsqrt.f32 %v70_v12 }
  0xd2   :  { %v316_v13 = vpop.eup %315 }
  0xd3   :  { %v64_v14 = vmul.f32 %v316_v13, %v56_v0 }
  0xd5   :  { %v80_v15 = vmul.f32 10.0, %v64_v14 }
  0xd6   :  { %v318_v16 = vpop.eup %317 }
  0xd7   :  { %v72_v17 = vmul.f32 %v318_v16, %v65_v1  ;;  %81 = vst.msk [vmem:[#allocation2] sm:$0xff] %vm58_vm0, %v80_v15 }
  0xd9   :  { %v73_v18 = vmul.f32 %v72_v17, %v64_v14  ;;  %v82_v19 = vmul.f32 10.0, %v72_v17 }
  0xdb   :  { %v74_v20 = vsel %vm58_vm0, %v73_v18, 0.0  ;;  %83 = vst.msk [vmem:[#allocation3] sm:$0xff] %vm58_vm0, %v82_v19 }
  0xdc   :  { %75 = vadd.xlane.f32.xlu1 %v74_v20 }
  0xde   :  { %v87_v21 = vld [vmem:[#allocation2] sm:$0xff] }
  0xdf   :  { %300 = vmatmul.mubr.msk.f32.vlgmr.msra.gmra.mrb[0].mxu0 %vm58_vm0, %v87_v21 }
  0xe2   :  { %v166_v22 = vld [vmem:[#allocation3] sm:$0xff] }
  0xe3   :  { %305 = vmatmul.mubr.msk.f32.vlgmr.msra.gmra.mrb[0].mxu1 %vm58_vm0, %v166_v22 }
 0x169   :  { %v76_v24 = vpop.xlane.xlu1 %75 }
 0x16a   :  { %v77_v25 = vmul.f32 10.0, %v76_v24 }
 0x16c   :  { %79 = vst.msk [vmem:[#allocation4] sm:$0xff] %vm78_vm2, %v77_v25 }
 0x173   :  { %v244_v26 = vld [vmem:[#allocation4] sm:$0xff] }
 0x174   :  { %248 = vperm.xlu1 %313, %v244_v26  }
 0x1b2   :  { %v162_v27 = vpop.f32.mrb[0].mxu0 }
 0x1b3   :  { %v301_v28 = vpop.f32.mrb[1].mxu0 }
 0x1b6   :  { %v240_v29 = vpop.f32.mrb[0].mxu1 }
 0x1b7   :  { %v306_v30 = vpop.f32.mrb[1].mxu1 }
 0x1f3   :  { %v249_v31 = vpop.permute.xlu1 %248 }
 0x1f4   :  { %v251_v32 = vsub.f32 %v162_v27, %v249_v31  ;;  %v258_v33 = vsub.f32 %v240_v29, %v249_v31 }
 0x1f6   :  { %v252_v34 = vmul.f32 1.442695, %v251_v32  ;;  %v259_v35 = vmul.f32 1.442695, %v258_v33 }
 0x1f8   :  { %319 = vpow2.f32 %v252_v34 }
 0x1f9   :  { %321 = vpow2.f32 %v259_v35 }
 0x202   :  { %v320_v38 = vpop.eup %319 }
 0x203   :  { %v322_v39 = vpop.eup %321  ;;  %v254_v40 = vadd.f32 %v320_v38, %v245_v36 }
 0x204   :  { %v261_v41 = vadd.f32 %v322_v39, %v257_v37 }
 0x205   :  { %256 = vst.msk [vmem:[#allocation5] sm:$0xff] %vm84_vm3, %v254_v40 }
 0x206   :  { %262 = vst.msk [vmem:[#allocation6] sm:$0xff] %vm84_vm3, %v261_v41 }
 0x20c   :  { %v266_v42 = vld [vmem:[#allocation5] sm:$0xff] }
 0x20d   :  { %v267_v43 = vsel %vm84_vm3, %v266_v42, 0.0  ;;  %v270_v44 = vld [vmem:[#allocation6] sm:$0xff] }
 0x20e   :  { %268 = vadd.xlane.f32.xlu0 %v267_v43  ;;  %v271_v45 = vsel %vm84_vm3, %v270_v44, 0.0 }
 0x212   :  { %272 = vadd.xlane.f32.xlu0 %v271_v45 }
 0x29b   :  { %v269_v46 = vpop.xlane.xlu0 %268 }
 0x29c   :  { %v274_v47 = vadd.f32 1.0, %v269_v46 }
 0x29e   :  { %323 = vlog2.f32 %v274_v47 }
 0x29f   :  { %v273_v48 = vpop.xlane.xlu0 %272 }
 0x2a0   :  { %v277_v49 = vadd.f32 1.0, %v273_v48 }
 0x2a2   :  { %325 = vlog2.f32 %v277_v49 }
 0x2a8   :  { %v324_v50 = vpop.eup %323 }
 0x2a9   :  { %v276_v52 = vmul.f32 0.6931472, %v324_v50 }
 0x2ac   :  { %v326_v51 = vpop.eup %325 }
 0x2ad   :  { %v279_v53 = vmul.f32 0.6931472, %v326_v51 }
 0x2af   :  { %v280_v54 = vadd.f32 %v279_v53, %v276_v52 }
 0x2b1   :  { %282 = vst.msk [vmem:[%s491_s4] sm:$0xff] %vm78_vm2, %v280_v54 }
 0x2b2   :  { %287 = vsyncpa [#allocation8], 1 }
 0x2b3   :  { %288 = vsyncpa [#allocation10], 1 }

</bundles_post_ra>
